<compile_context>
chip_gen: v7x
topology: tpu7x:2x2x1
jax: 0.10.0
libtpu: 0.0.40
codegen_flags: <defaults>
</compile_context>

<pallas_src>
import jax
import jax.numpy as jnp
import numpy as np
from jax.experimental import pallas as pl
from jax.experimental.pallas import tpu as pltpu


# -----------------------------------------------------------------------------
# Kernel
# -----------------------------------------------------------------------------
def _spatial_softmax_kernel(x_ref, w_ref, pos_ref, out_ref, logits_ref):
    # x_ref:      (Bt, C, HW)         VMEM (f32 or bf16)
    # w_ref:      (K_pad, C)          VMEM (1x1 conv weight, 1/T folded in, zero-padded rows)
    # pos_ref:    (3, HW)             VMEM (rows: pos_x, pos_y, ones)
    # out_ref:    (Bt*K_pad, 2)       VMEM
    # logits_ref: (Bt*K_pad, HW) f32  VMEM scratch
    bt = x_ref.shape[0]
    k_pad = w_ref.shape[0]
    w = w_ref[...]

    # 1x1 conv: one small 2-D (K_pad, C) @ (C, HW) matmul per image, written straight
    # into the 2-D (Bt*K_pad, HW) working layout (no w broadcast, no batched einsum).
    def conv_body(b, carry):
        row = pl.multiple_of(b * k_pad, k_pad)
        logits_ref[pl.ds(row, k_pad), :] = jnp.dot(
            w, x_ref[b], preferred_element_type=jnp.float32)
        return carry

    jax.lax.fori_loop(0, bt, conv_body, 0)

    # Numerically-stable softmax over HW, normalization deferred.
    logits = logits_ref[...]                                    # (Bt*K_pad, HW)
    m = jnp.max(logits, axis=-1, keepdims=True)                 # (Bt*K_pad, 1)
    e = jnp.exp(logits - m)                                     # (Bt*K_pad, HW), <= 1
    # TODO(synk): on v7x, if the bundle shows EUP saturation, compute this exp in bf16
    # (bf16 EUP) and/or flip pl.reciprocal below to approx=True; skip on v5e (no bf16 EUP).

    # Fused expectation + row-sum: columns = [sum e*pos_x, sum e*pos_y, sum e].
    moments = jax.lax.dot_general(
        e, pos_ref[...],
        dimension_numbers=(((1,), (1,)), ((), ())),
        preferred_element_type=jnp.float32)                     # (Bt*K_pad, 3)

    inv_s = pl.reciprocal(moments[:, 2:3], approx=False)        # (Bt*K_pad, 1)
    out_ref[...] = moments[:, 0:2] * inv_s                      # (Bt*K_pad, 2)

    # TODO(synk): output_var covariance branch and training-mode Gaussian noise
    # (noise_std) are not implemented; defaults (output_var=False, eval mode) make this
    # forward pass complete. If output_var is ever added, the bias-drop /
    # deferred-normalization shortcuts must be revisited.


# -----------------------------------------------------------------------------
# VMEM-aware, generation-aware tiling
# -----------------------------------------------------------------------------
# (per-step VMEM budget bytes, minimum number of grid steps, hard vmem-limit cap)
_GEN_PROFILE = {
    "v7x":     (40 << 20, 2, 48 << 20),    # 64 MiB physical; keep 2 TCs busy
    "v6e":     (100 << 20, 1, 110 << 20),  # 128 MiB physical, single TC
    "v5e":     (100 << 20, 1, 110 << 20),  # 128 MiB physical, 16 MiB scoped default
    "other":   (40 << 20, 1, 48 << 20),    # conservative fallback
    "unknown": (40 << 20, 1, 48 << 20),
}


def _tpu_generation():
    try:
        kind = jax.devices()[0].device_kind.lower()
    except Exception:
        return "unknown"
    if "v7" in kind:
        return "v7x"
    if "v6" in kind:
        return "v6e"
    if "v5" in kind and ("lite" in kind or "5e" in kind):
        return "v5e"
    return "other"


def _step_vmem_bytes(bt, c, hw, k_pad, in_itemsize=4):
    """Rough per-grid-step VMEM footprint."""
    c_pad = -(-c // 8) * 8
    hw_pad = -(-hw // 128) * 128
    x_block = 2 * bt * c_pad * hw_pad * in_itemsize        # double-buffered x tile
    interm = 4 * bt * k_pad * hw_pad * 4                   # logits scratch + exp/sub temps (f32)
    small = (k_pad * 128 + 8 * hw_pad + 4 * bt * k_pad * 128) * 4   # w, pos, out blocks
    return x_block + interm + small


def _pick_batch_tile(batch, c, hw, k_pad, budget_bytes, min_grid_steps, in_itemsize=4):
    """Largest divisor of `batch` whose per-step footprint fits the VMEM budget while
    keeping at least `min_grid_steps` grid steps (2 on v7x for its two TensorCores)."""
    min_grid_steps = max(1, min(min_grid_steps, batch))
    best = 1
    for bt in range(1, batch + 1):
        if batch % bt:
            continue
        if (batch // bt) < min_grid_steps:
            continue
        if _step_vmem_bytes(bt, c, hw, k_pad, in_itemsize) <= budget_bytes:
            best = bt
    return best


# -----------------------------------------------------------------------------
# Wrapper
# -----------------------------------------------------------------------------
def spatial_softmax(x_nchw, conv_w, conv_b, pos, temperature,
                    batch_tile=None, input_dtype=jnp.float32):
    """x_nchw: (B, C, H, W); conv_w: (K, C); conv_b: (K,) (unused - cancels in softmax);
    pos: (2, H*W); temperature: python float / 0-d array.
    input_dtype: jnp.float32 (default) or jnp.bfloat16 for the HBM-bound fast path
    (softmax math stays f32 either way)."""
    B, C, H, W = x_nchw.shape
    HW = H * W
    K = conv_w.shape[0]
    K_pad = -(-K // 8) * 8
    itemsize = jnp.dtype(input_dtype).itemsize

    gen = _tpu_generation()
    budget, min_steps, limit_cap = _GEN_PROFILE.get(gen, _GEN_PROFILE["unknown"])

    if batch_tile is None:
        Bt = _pick_batch_tile(B, C, HW, K_pad, budget, min_steps, itemsize)
    else:
        Bt = batch_tile
    assert B % Bt == 0

    x_flat = x_nchw.reshape(B, C, HW).astype(input_dtype)

    # Fold 1/temperature into the weight (forward-pass only; exact for T=1) and
    # zero-pad keypoints to a multiple of 8.
    w_scaled = conv_w.astype(jnp.float32) / jnp.asarray(temperature, jnp.float32)
    w_pad = jnp.zeros((K_pad, C), jnp.float32).at[:K].set(w_scaled).astype(input_dtype)
    # conv_b intentionally unused: a per-keypoint constant cancels in the spatial softmax.

    # pos_aug = [pos_x; pos_y; ones] -> the ones row fuses the softmax row-sum into the
    # expectation matmul (column 2 of the result == sum of exp).
    pos_aug = jnp.concatenate(
        [pos.astype(jnp.float32), jnp.ones((1, HW), jnp.float32)], axis=0)   # (3, HW)

    need = _step_vmem_bytes(Bt, C, HW, K_pad, itemsize)
    vmem_limit = int(min(limit_cap, max(32 << 20, 2 * need)))

    out2d = pl.pallas_call(
        _spatial_softmax_kernel,
        out_shape=jax.ShapeDtypeStruct((B * K_pad, 2), jnp.float32),
        grid_spec=pltpu.PrefetchScalarGridSpec(
            num_scalar_prefetch=0,
            grid=(B // Bt,),
            in_specs=[
                pl.BlockSpec((Bt, C, HW), lambda b: (b, 0, 0)),
                pl.BlockSpec((K_pad, C), lambda b: (0, 0)),
                pl.BlockSpec((3, HW), lambda b: (0, 0)),
            ],
            out_specs=pl.BlockSpec((Bt * K_pad, 2), lambda b: (b, 0)),
            scratch_shapes=[pltpu.VMEM((Bt * K_pad, HW), jnp.float32)],
        ),
        compiler_params=pltpu.CompilerParams(
            dimension_semantics=("parallel",),
            vmem_limit_bytes=vmem_limit,
        ),
    )(x_flat, w_pad, pos_aug)

    return out2d.reshape(B, K_pad, 2)[:, :K, :]


# -----------------------------------------------------------------------------
# Host-side helpers / reference
# -----------------------------------------------------------------------------
def make_pos_grid(height, width):
    # Matches torch.meshgrid(linspace(-1,1,W), linspace(-1,1,H), indexing='xy')
    xs = jnp.linspace(-1.0, 1.0, width)
    ys = jnp.linspace(-1.0, 1.0, height)
    pos_x, pos_y = jnp.meshgrid(xs, ys, indexing="xy")                 # each (H, W)
    pos = jnp.stack([pos_x.reshape(-1), pos_y.reshape(-1)], axis=0)    # (2, H*W)
    return pos.astype(jnp.float32)


def reference_spatial_softmax(x_nchw, conv_w, conv_b, pos, temperature):
    # Bias-including, explicitly-normalized reference (mirrors the PyTorch forward) —
    # validates the bias-drop / fused-row-sum / deferred-normalization simplifications.
    B, C, H, W = x_nchw.shape
    feat = jnp.einsum("kc,bchw->bkhw", conv_w, x_nchw) + conv_b[None, :, None, None]
    flat = feat.reshape(B * conv_w.shape[0], H * W) / temperature
    attn = jax.nn.softmax(flat, axis=-1)
    expec_x = jnp.sum(pos[0][None, :] * attn, axis=1)
    expec_y = jnp.sum(pos[1][None, :] * attn, axis=1)
    return jnp.stack([expec_x, expec_y], axis=-1).reshape(B, conv_w.shape[0], 2)


if __name__ == "__main__":
    # Module config: input_shape=(C=4, H=16, W=16), num_key_points=7, temp=1.0
    B, C, H, W = 2, 4, 16, 16
    K = 7
    temperature = 1.0

    key = jax.random.PRNGKey(0)
    kx, kw, kb = jax.random.split(key, 3)

    x = jax.random.normal(kx, (B, C, H, W), dtype=jnp.float32)
    bound = 1.0 / np.sqrt(C)  # nn.Conv2d default uniform bound for kernel_size=1
    conv_w = jax.random.uniform(kw, (K, C), minval=-bound, maxval=bound, dtype=jnp.float32)
    conv_b = jax.random.uniform(kb, (K,), minval=-bound, maxval=bound, dtype=jnp.float32)

    pos = make_pos_grid(H, W)

    out = spatial_softmax(x, conv_w, conv_b, pos, temperature)
    out = jax.block_until_ready(out)

    ref = reference_spatial_softmax(x, conv_w, conv_b, pos, temperature)
    assert out.shape == (B, K, 2)
    assert np.allclose(np.asarray(out), np.asarray(ref), atol=1e-5, rtol=1e-5)

    print("KERNEL_OK")
</pallas_src>

<mosaic_0001>
module attributes {stable_mosaic.version = 11 : i64} {
  func.func @_spatial_softmax_kernel(%arg0: i32, %arg1: memref<2x4x256xf32, #tpu.memory_space<vmem>>, %arg2: memref<8x4xf32, #tpu.memory_space<vmem>>, %arg3: memref<3x256xf32, #tpu.memory_space<vmem>>, %arg4: memref<16x2xf32, #tpu.memory_space<vmem>>, %arg5: memref<16x256xf32, #tpu.memory_space<vmem>>) attributes {dimension_semantics = [#tpu.dimension_semantics<parallel>], iteration_bounds = array<i64: 1>, scalar_prefetch = 0 : i64, scratch_operands = 1 : i64, tpu.core_type = #tpu.core_type<tc>, window_params = [{transform_indices = @transform_0, window_bounds = array<i64: 2, 4, 256>}, {pipeline_mode = #tpu.pipeline_mode<synchronous>, transform_indices = @transform_1, window_bounds = array<i64: 8, 4>}, {pipeline_mode = #tpu.pipeline_mode<synchronous>, transform_indices = @transform_2, window_bounds = array<i64: 3, 256>}, {transform_indices = @transform_3, window_bounds = array<i64: 16, 2>}]} {
    %c0 = arith.constant 0 : index
    %c0_0 = arith.constant 0 : index
    %0 = vector.load %arg2[%c0, %c0_0] : memref<8x4xf32, #tpu.memory_space<vmem>>, vector<8x4xf32>
    %c0_i32 = arith.constant 0 : i32
    %c2_i32 = arith.constant 2 : i32
    %1 = arith.addi %c0_i32, %c2_i32 : i32
    %c1_i32 = arith.constant 1 : i32
    scf.for %arg6 = %c0_i32 to %1 step %c1_i32  : i32 {
      %c8_i32 = arith.constant 8 : i32
      %16 = arith.muli %arg6, %c8_i32 : i32
      %17 = tpu.assume_multiple %16, 8 : i32
      %18 = arith.index_cast %arg6 : i32 to index
      %c0_9 = arith.constant 0 : index
      %c0_10 = arith.constant 0 : index
      %19 = vector.load %arg1[%18, %c0_9, %c0_10] : memref<2x4x256xf32, #tpu.memory_space<vmem>>, vector<1x4x256xf32>
      %20 = vector.shape_cast %19 : vector<1x4x256xf32> to vector<4x256xf32>
      %cst_11 = arith.constant dense<0.000000e+00> : vector<8x256xf32>
      %21 = tpu.matmul %0, %20, %cst_11 {dimension_numbers = #tpu.dot_dimension_numbers<[1], [0], [0], [1], [0, 0, 1, 1], [], []>} : vector<8x4xf32>, vector<4x256xf32>, vector<8x256xf32> -> vector<8x256xf32>
      %22 = arith.index_cast %17 : i32 to index
      %c0_12 = arith.constant 0 : index
      %23 = vector.load %arg5[%22, %c0_12] : memref<16x256xf32, #tpu.memory_space<vmem>>, vector<8x256xf32>
      tpu.vector_store %arg5[%22, %c0_12], %21 {strides = array<i32>} : memref<16x256xf32, #tpu.memory_space<vmem>>, vector<8x256xf32>,
    }
    %c2_i32_1 = arith.constant 2 : i32
    %c0_2 = arith.constant 0 : index
    %c0_3 = arith.constant 0 : index
    %2 = vector.load %arg5[%c0_2, %c0_3] : memref<16x256xf32, #tpu.memory_space<vmem>>, vector<16x256xf32>
    %cst = arith.constant dense<0xFF800000> : vector<16xf32>
    %3 = vector.multi_reduction <maximumf>, %2, %cst [1] : vector<16x256xf32> to vector<16xf32>
    %4 = vector.shape_cast %3 : vector<16xf32> to vector<16x1xf32>
    %5 = vector.broadcast %4 : vector<16x1xf32> to vector<16x256xf32>
    %6 = arith.subf %2, %5 : vector<16x256xf32>
    %7 = math.exp %6 : vector<16x256xf32>
    %c0_4 = arith.constant 0 : index
    %c0_5 = arith.constant 0 : index
    %8 = vector.load %arg3[%c0_4, %c0_5] : memref<3x256xf32, #tpu.memory_space<vmem>>, vector<3x256xf32>
    %cst_6 = arith.constant dense<0.000000e+00> : vector<16x3xf32>
    %9 = tpu.matmul %7, %8, %cst_6 {dimension_numbers = #tpu.dot_dimension_numbers<[1], [1], [0], [0], [0, 0, 1, 0], [], []>} : vector<16x256xf32>, vector<3x256xf32>, vector<16x3xf32> -> vector<16x3xf32>
    %10 = vector.extract_strided_slice %9 {offsets = [0, 2], sizes = [16, 1], strides = [1, 1]} : vector<16x3xf32> to vector<16x1xf32>
    %11 = tpu.reciprocal %10 : vector<16x1xf32> -> vector<16x1xf32>
    %12 = vector.extract_strided_slice %9 {offsets = [0, 0], sizes = [16, 2], strides = [1, 1]} : vector<16x3xf32> to vector<16x2xf32>
    %13 = vector.broadcast %11 : vector<16x1xf32> to vector<16x2xf32>
    %14 = arith.mulf %12, %13 : vector<16x2xf32>
    %c0_7 = arith.constant 0 : index
    %c0_8 = arith.constant 0 : index
    %15 = vector.load %arg4[%c0_7, %c0_8] : memref<16x2xf32, #tpu.memory_space<vmem>>, vector<16x2xf32>
    tpu.vector_store %arg4[%c0_7, %c0_8], %14 {strides = array<i32>} : memref<16x2xf32, #tpu.memory_space<vmem>>, vector<16x2xf32>,
    return
  }
  func.func @transform_0(%arg0: i32) -> (i32, i32, i32) {
    %c0_i32 = arith.constant 0 : i32
    %c0_i32_0 = arith.constant 0 : i32
    %c0_i32_1 = arith.constant 0 : i32
    return %arg0, %c0_i32, %c0_i32_0 : i32, i32, i32
  }
  func.func @transform_1(%arg0: i32) -> (i32, i32) {
    %c0_i32 = arith.constant 0 : i32
    %c0_i32_0 = arith.constant 0 : i32
    %c0_i32_1 = arith.constant 0 : i32
    return %c0_i32, %c0_i32_0 : i32, i32
  }
  func.func @transform_2(%arg0: i32) -> (i32, i32) {
    %c0_i32 = arith.constant 0 : i32
    %c0_i32_0 = arith.constant 0 : i32
    %c0_i32_1 = arith.constant 0 : i32
    return %c0_i32, %c0_i32_0 : i32, i32
  }
  func.func @transform_3(%arg0: i32) -> (i32, i32) {
    %c0_i32 = arith.constant 0 : i32
    %c0_i32_0 = arith.constant 0 : i32
    return %arg0, %c0_i32 : i32, i32
  }
}

</mosaic_0001>

<bundles_post_ra>
// kernel: tpu_custom_call.1
= control target key start
LH: loop header
LB: loop body
LE: loop exit
PB: predicated region body
PF: predicated region fallthrough
CT: control target
= control target key end

     0   :  { %8 = vsyncpa [#allocation4], 0  ;;  %s334_s12 = smov [#allocation3]   ;;  %s383_s0 = inlined_call_operand.hbm [shape: f32[2,4,256], index: 0, kind: input, shape index: {}]   ;;  %s384_s1 = inlined_call_operand.vmem [shape: f32[8,4], index: 1, kind: input, shape index: {}]   ;;  %s385_s2 = inlined_call_operand.vmem [shape: f32[3,256], index: 2, kind: input, shape index: {}]   ;;  %s386_s3 = inlined_call_operand.vmem [shape: f32[16,2], index: 3, kind: output, shape index: {}]  }
   0x1   :  { %s14_s13 = sshll.u32 %s334_s12, 4  ;;  %s302_s16 = scalar_lea.hbm %s383_s0, 256  ;;  %s15_s13 = int_to_ptr.vmem [resolvable:$true] %s14_s13 }
   0x2   :  { %p303_p0 = scmp.ne.s32.totalorder %s383_s0, %s302_s16  ;;  %p306_p1 = scmp.lt.u32.totalorder %s302_s16, %s383_s0 }
   0x4   :  { %p308_p2 = pnand %p306_p1, %p303_p0 }
   0x6   :  { %311 = shalt.err (!%p308_p2)
}
   0x7   :  { %s312_s21 = scalar_lea.vmem %s15_s13, 256  ;;  %p317_p4 = scmp.lt.s32.totalorder %s15_s13, %s15_s13 }
   0x8   :  { %p313_p3 = scmp.ne.s32.totalorder %s15_s13, %s312_s21  ;;  %p318_p5 = scmp.lt.s32.totalorder %s312_s21, %s312_s21 }
   0xa   :  { %p319_p6 = por %p318_p5, %p317_p4 }
   0xc   :  { %p320_p7 = pnand %p319_p6, %p313_p3 }
   0xe   :  { %323 = shalt.err (!%p320_p7)
}
   0xf   :  { %s335_s22 = smov 128   ;;  %s336_s23 = smov 8  }
  0x10   :  { %20 = dma.hbm_to_vmem [thread:$0]  %s383_s0, 256, %s15_s13, [#allocation4], %s335_s22, %s335_s22, %s336_s23  }
  0x11   :  { %328 = dma.done.wait [#allocation4], 256  }
  0x12   :  { %329 = vsyncadd [#allocation4], 4294967040  ;;  %v28_v0 = vld [vmem:[%s384_s1] sm:$0xff]  ;;  %s330_s28 = smov 0  }
  0x13 LB: > { %v337_v1 = vmov 0.0   ;;  %s261_s29 = sshll.u32 %s332_s28, 3  ;;  %vm46_vm0 = vcmask 1043456   ;;  %vm42_vm1 = vcmask 31744   ;;  %s34_s28 = sadd.s32 1, %s332_s28   ;;  %s332_s28 = sphi %s330_s28, %s34_s28  }
  0x14   : > { %115 = vmatprep.mubr.f32.mxu0 %v337_v1  ;;  %s38_s30 = scalar_lea.vmem [#allocation3], %s261_s29  ;;  %s122_s0 = sshra.s32 %s261_s29, 3 }
  0x15   : > { %v39_v2 = vld [vmem:[%s38_s30] sm:$0xff]  ;;  %s270_s4 = sshll.u32 %s122_s0, 4  ;;  %p31_p8 = scmp.ge.s32.totalorder %s34_s28, 2  }
  0x16   : > { %v41_v3 = vcombine.high %v39_v2, %v39_v2  ;;  %s126_s5 = scalar_lea.vmem [#allocation2], %s270_s4  ;;  %v151_v12 = vld [vmem:[%s385_s2] sm:$0x77] (%p31_p8)  ;;  %v338_v28 = vmov (%p31_p8), 2   ;;  %vm244_vm2 = vcmask (%p31_p8), 15360  }
  0x17   :  { %v153_v13 = vcombine.high (%p31_p8), %v151_v12, %v151_v12  ;;  %287 = vset.pattern.permute.xlu1 (%p31_p8), %v338_v28  ;;  %288 = vset.pattern.permute.xlu0 (%p31_p8), %v338_v28 }
  0x18   : > { %264 = vmatprep.subr.msk.mxu0 %vm46_vm0, %v41_v3 }
  0x19   : > { %265 = vmatpush1.msk.msra.mxu0 %vm46_vm0, %v39_v2  ;;  %271 = vmatprep.subr.mxu1 (%p31_p8), %v153_v13 }
  0x1a   : > { %266 = vmatmul.mubr.msk.f32.vlgmr.msra.gmra.mrb[0].mxu0 %vm42_vm1, %v28_v0  ;;  %155 = vmatprep.subr.mxu0 (%p31_p8), %v153_v13 }
  0x1b   :  { %272 = vmatpush1.xpose.msra.mxu1 (%p31_p8), %v151_v12 }
  0x20   :  { %156 = vmatpush1.xpose.msra.mxu0 (%p31_p8), %v151_v12 }
  0xe9   :  { %33 = sbr.rel (!%p31_p8) target bundleno = 19 (0x13), region = 45 }
  0xed   : > { %v117_v4 = vpop.f32.mrb[0].mxu0 }
  0xee   : > { %127 = vst [vmem:[%s126_s5] sm:$0xff] %v117_v4  ;;  %v119_v5 = vpop.f32.mrb[1].mxu0 }
  0xef   : > { %128 = vst [vmem:[%s126_s5 + $0x8] sm:$0xff] %v119_v5 }
  0xf6   :  { %v129_v6 = vld [vmem:[#allocation2] sm:$0xff]  ;;  %v130_v7 = vld [vmem:[#allocation2 + $0x8] sm:$0xff]  ;;  %v131_v8 = vld [vmem:[#allocation2 + $0x10] sm:$0xff] }
  0xf7   :  { %v133_v9 = vmax.f32 %v129_v6, %v130_v7  ;;  %v132_v10 = vld [vmem:[#allocation2 + $0x18] sm:$0xff] }
  0xf8   :  { %v136_v11 = vmax.f32 %v131_v8, %v132_v10 }
  0xf9   :  { %134 = vmax.xlane.f32.xlu0 %v133_v9 }
  0xfd   :  { %137 = vmax.xlane.f32.xlu0 %v136_v11 }
 0x186   :  { %v135_v14 = vpop.xlane.xlu0 %134 }
 0x187   :  { %v139_v15 = vsub.f32 %v129_v6, %v135_v14  ;;  %v140_v16 = vsub.f32 %v130_v7, %v135_v14 }
 0x189   :  { %v143_v17 = vmul.f32 1.442695, %v139_v15  ;;  %v145_v18 = vmul.f32 1.442695, %v140_v16 }
 0x18a   :  { %v138_v19 = vpop.xlane.xlu0 %137 }
 0x18b   :  { %290 = vpow2.f32 %v143_v17  ;;  %v141_v20 = vsub.f32 %v131_v8, %v138_v19  ;;  %v142_v21 = vsub.f32 %v132_v10, %v138_v19 }
 0x18c   :  { %292 = vpow2.f32 %v145_v18 }
 0x18d   :  { %v147_v22 = vmul.f32 1.442695, %v141_v20  ;;  %v149_v23 = vmul.f32 1.442695, %v142_v21 }
 0x18f   :  { %294 = vpow2.f32 %v147_v22 }
 0x190   :  { %296 = vpow2.f32 %v149_v23 }
 0x195   :  { %v291_v24 = vpop.eup %290 }
 0x196   :  { %v293_v25 = vpop.eup %292 }
 0x197   :  { %219 = vmatprep.mubr.f32.mxu0 %v293_v25 }
 0x198   :  { %220 = vmatmul.mubr.f32.vlgmr.msra.gmra.mrb[0].mxu0 %v291_v24 }
 0x199   :  { %v295_v26 = vpop.eup %294 }
 0x19a   :  { %v297_v27 = vpop.eup %296 }
 0x19b   :  { %224 = vmatprep.mubr.f32.mxu1 %v297_v27 }
 0x19c   :  { %225 = vmatmul.mubr.f32.vlgmr.msra.gmra.mrb[0].mxu1 %v295_v26 }
 0x26b   :  { %v221_v29 = vpop.f32.mrb[0].mxu0 }
 0x26c   :  { %298 = vrcp.f32 %v221_v29  ;;  %v223_v30 = vpop.f32.mrb[1].mxu0 }
 0x26f   :  { %v226_v31 = vpop.f32.mrb[0].mxu1 }
 0x270   :  { %300 = vrcp.f32 %v226_v31  ;;  %v228_v32 = vpop.f32.mrb[1].mxu1 }
 0x276   :  { %v299_v33 = vpop.eup %298 }
 0x277   :  { %234 = vperm.xlu1 %287, %v299_v33  }
 0x27a   :  { %v301_v34 = vpop.eup %300 }
 0x27b   :  { %239 = vperm.xlu1 %287, %v301_v34  }
 0x2f6   :  { %v235_v35 = vpop.permute.xlu1 %234 }
 0x2f7   :  { %v242_v36 = vmul.f32 %v235_v35, %v221_v29 }
 0x2f9   :  { %245 = vst.msk [vmem:[%s386_s3] sm:$0xff] %vm244_vm2, %v242_v36 }
 0x2fa   :  { %v240_v37 = vpop.permute.xlu1 %239 }
 0x2fb   :  { %v243_v38 = vmul.f32 %v240_v37, %v226_v31 }
 0x2fd   :  { %246 = vst.msk [vmem:[%s386_s3 + $0x8] sm:$0xff] %vm244_vm2, %v243_v38 }
 0x2fe   :  { %251 = vsyncpa [#allocation4], 1 }

</bundles_post_ra>
